<compile_context>
chip_gen: v5e
topology: v5e:2x2
jax: 0.10.0
libtpu: 0.0.40
codegen_flags: <defaults>
</compile_context>

<pallas_src>
import jax
import jax.numpy as jnp
from jax.experimental import pallas as pl
from jax.experimental.pallas import tpu as pltpu

LANES = 128


def _make_outconv_kernel(c_in, c_out):
    def kernel(w_ref, b_ref, x_ref, o_ref):
        # w_ref: SMEM (c_out, c_in)   b_ref: SMEM (c_out,)
        # x_ref: VMEM (c_in, R, 128)  o_ref: VMEM (c_out, R, 128)   (N squeezed)
        # Hoist the tiny parameter reads out of the unrolled FMA chains.
        w = [[w_ref[co, ci] for ci in range(c_in)] for co in range(c_out)]
        b = [b_ref[co] for co in range(c_out)]
        for co in range(c_out):                       # tiny static loops -> unrolled VPU FMAs
            acc = x_ref[0].astype(jnp.float32) * w[co][0]
            for ci in range(1, c_in):
                acc = acc + x_ref[ci].astype(jnp.float32) * w[co][ci]
            o_ref[co] = (acc + b[co]).astype(o_ref.dtype)
    return kernel


def _pick_rows_per_tile(s_rows, n_batch, cap_rows=1024, min_grid_steps=8):
    """Rows (of 128 lanes) per spatial tile.

    Big tiles amortize the ~0.35us per-grid-step overhead; the cap keeps the
    double-buffered tiles inside every generation's scoped VMEM.  Tiles shrink
    for small problems so the grid keeps >= ~min_grid_steps steps (v7x megacore
    split + pipelining).  Non-full-extent tiles are kept a multiple of 8 rows
    (sublane layout constraint); a ceil-div grid handles the partial last tile.
    """
    min_tiles = max(1, -(-min_grid_steps // max(1, n_batch)))   # ceil
    r = -(-s_rows // min_tiles)                                  # ceil
    r = min(r, cap_rows, s_rows)
    if r < s_rows:
        r = max(8, (r // 8) * 8)
        r = min(r, s_rows)
    return max(1, r)


def outconv_forward(x, weight, bias, *, rows_per_tile_cap=1024):
    """x: (N, C_in, D, H, W); weight: (C_out, C_in, 1, 1, 1); bias: (C_out,)."""
    n, c_in, d, h, w = x.shape
    c_out = weight.shape[0]
    s = d * h * w
    s_rows = -(-s // LANES)           # ceil-div
    s_pad = s_rows * LANES

    # Free reshape (merge of trailing contiguous dims); no HBM transposes.
    x_flat = x.reshape(n, c_in, s)
    if s_pad != s:
        # Rare: pad flattened spatial axis to a lane multiple so it can be
        # viewed as (rows, 128); extra columns are sliced off afterwards.
        x_flat = jnp.pad(x_flat, ((0, 0), (0, 0), (0, s_pad - s)))
    x_blk = x_flat.reshape(n, c_in, s_rows, LANES)   # free reshape

    w_mat = weight.reshape(c_out, c_in).astype(jnp.float32)
    b_vec = bias.astype(jnp.float32)

    r = _pick_rows_per_tile(s_rows, n, cap_rows=rows_per_tile_cap)
    grid = (n, pl.cdiv(s_rows, r))

    itemsize = jnp.dtype(x.dtype).itemsize
    cost = pl.CostEstimate(
        flops=2 * n * s * c_in * c_out,
        transcendentals=0,
        bytes_accessed=(c_in + c_out) * n * s * itemsize,
    )

    y_blk = pl.pallas_call(
        _make_outconv_kernel(c_in, c_out),
        out_shape=jax.ShapeDtypeStruct((n, c_out, s_rows, LANES), x.dtype),
        grid_spec=pltpu.PrefetchScalarGridSpec(
            num_scalar_prefetch=0,
            grid=grid,
            in_specs=[
                # Tiny parameters resident in SMEM for the whole grid.
                pl.BlockSpec(memory_space=pltpu.MemorySpace.SMEM),
                pl.BlockSpec(memory_space=pltpu.MemorySpace.SMEM),
                # Activations: lane-dense (rows, 128) slabs per channel.
                pl.BlockSpec((None, c_in, r, LANES), lambda i, j: (i, 0, j, 0)),
            ],
            out_specs=pl.BlockSpec((None, c_out, r, LANES), lambda i, j: (i, 0, j, 0)),
        ),
        compiler_params=pltpu.CompilerParams(
            dimension_semantics=("parallel", "parallel"),
            vmem_limit_bytes=48 * 1024 * 1024,
        ),
        cost_estimate=cost,
    )(w_mat, b_vec, x_blk)

    y_flat = y_blk.reshape(n, c_out, s_pad)
    if s_pad != s:
        y_flat = y_flat[:, :, :s]
    return y_flat.reshape(n, c_out, d, h, w)         # free reshape back to NCDHW


if __name__ == "__main__":
    key = jax.random.PRNGKey(0)
    k_x, k_w, k_b = jax.random.split(key, 3)

    N, C_IN, C_OUT, D, H, W = 2, 4, 3, 8, 8, 8
    x = jax.random.normal(k_x, (N, C_IN, D, H, W), dtype=jnp.float32)
    # Deterministic synthetic parameters (shapes match nn.Conv3d(C_IN, C_OUT, 1)).
    weight = jax.random.normal(k_w, (C_OUT, C_IN, 1, 1, 1), dtype=jnp.float32) * 0.1
    bias = jax.random.normal(k_b, (C_OUT,), dtype=jnp.float32) * 0.1

    out = outconv_forward(x, weight, bias)
    out = jax.block_until_ready(out)

    # Reference check in plain JAX (einsum over channels + bias).
    ref = jnp.einsum("ncdhw,oc->nodhw", x, weight.reshape(C_OUT, C_IN)) \
          + bias.reshape(1, C_OUT, 1, 1, 1)
    assert out.shape == (N, C_OUT, D, H, W)
    assert jnp.allclose(out, ref, atol=1e-5, rtol=1e-5)

    print("KERNEL_OK")
</pallas_src>

<mosaic_0001>
module attributes {stable_mosaic.version = 11 : i64} {
  func.func @kernel(%arg0: i32, %arg1: i32, %arg2: memref<3x4xf32, #tpu.memory_space<smem>>, %arg3: memref<3xf32, #tpu.memory_space<smem>>, %arg4: memref<1x4x4x128xf32, #tpu.memory_space<vmem>>, %arg5: memref<1x3x4x128xf32, #tpu.memory_space<vmem>>) attributes {dimension_semantics = [#tpu.dimension_semantics<parallel>, #tpu.dimension_semantics<parallel>], iteration_bounds = array<i64: 2, 1>, scalar_prefetch = 0 : i64, scratch_operands = 0 : i64, tpu.core_type = #tpu.core_type<tc>, window_params = [{transform_indices = @transform_0, window_bounds = array<i64: 3, 4>}, {transform_indices = @transform_1, window_bounds = array<i64: 3>}, {transform_indices = @transform_2, window_bounds = array<i64: 1, 4, 4, 128>}, {transform_indices = @transform_3, window_bounds = array<i64: 1, 3, 4, 128>}]} {
    %c0 = arith.constant 0 : index
    %c0_0 = arith.constant 0 : index
    %0 = memref.load %arg2[%c0, %c0_0] : memref<3x4xf32, #tpu.memory_space<smem>>
    %c0_1 = arith.constant 0 : index
    %c1 = arith.constant 1 : index
    %1 = memref.load %arg2[%c0_1, %c1] : memref<3x4xf32, #tpu.memory_space<smem>>
    %c0_2 = arith.constant 0 : index
    %c2 = arith.constant 2 : index
    %2 = memref.load %arg2[%c0_2, %c2] : memref<3x4xf32, #tpu.memory_space<smem>>
    %c0_3 = arith.constant 0 : index
    %c3 = arith.constant 3 : index
    %3 = memref.load %arg2[%c0_3, %c3] : memref<3x4xf32, #tpu.memory_space<smem>>
    %c1_4 = arith.constant 1 : index
    %c0_5 = arith.constant 0 : index
    %4 = memref.load %arg2[%c1_4, %c0_5] : memref<3x4xf32, #tpu.memory_space<smem>>
    %c1_6 = arith.constant 1 : index
    %c1_7 = arith.constant 1 : index
    %5 = memref.load %arg2[%c1_6, %c1_7] : memref<3x4xf32, #tpu.memory_space<smem>>
    %c1_8 = arith.constant 1 : index
    %c2_9 = arith.constant 2 : index
    %6 = memref.load %arg2[%c1_8, %c2_9] : memref<3x4xf32, #tpu.memory_space<smem>>
    %c1_10 = arith.constant 1 : index
    %c3_11 = arith.constant 3 : index
    %7 = memref.load %arg2[%c1_10, %c3_11] : memref<3x4xf32, #tpu.memory_space<smem>>
    %c2_12 = arith.constant 2 : index
    %c0_13 = arith.constant 0 : index
    %8 = memref.load %arg2[%c2_12, %c0_13] : memref<3x4xf32, #tpu.memory_space<smem>>
    %c2_14 = arith.constant 2 : index
    %c1_15 = arith.constant 1 : index
    %9 = memref.load %arg2[%c2_14, %c1_15] : memref<3x4xf32, #tpu.memory_space<smem>>
    %c2_16 = arith.constant 2 : index
    %c2_17 = arith.constant 2 : index
    %10 = memref.load %arg2[%c2_16, %c2_17] : memref<3x4xf32, #tpu.memory_space<smem>>
    %c2_18 = arith.constant 2 : index
    %c3_19 = arith.constant 3 : index
    %11 = memref.load %arg2[%c2_18, %c3_19] : memref<3x4xf32, #tpu.memory_space<smem>>
    %c0_20 = arith.constant 0 : index
    %12 = memref.load %arg3[%c0_20] : memref<3xf32, #tpu.memory_space<smem>>
    %c1_21 = arith.constant 1 : index
    %13 = memref.load %arg3[%c1_21] : memref<3xf32, #tpu.memory_space<smem>>
    %c2_22 = arith.constant 2 : index
    %14 = memref.load %arg3[%c2_22] : memref<3xf32, #tpu.memory_space<smem>>
    %c0_23 = arith.constant 0 : index
    %c0_24 = arith.constant 0 : index
    %c0_25 = arith.constant 0 : index
    %c0_26 = arith.constant 0 : index
    %15 = vector.load %arg4[%c0_23, %c0_24, %c0_25, %c0_26] : memref<1x4x4x128xf32, #tpu.memory_space<vmem>>, vector<1x1x4x128xf32>
    %16 = vector.shape_cast %15 : vector<1x1x4x128xf32> to vector<4x128xf32>
    %17 = vector.broadcast %0 : f32 to vector<4x128xf32>
    %18 = arith.mulf %16, %17 : vector<4x128xf32>
    %c0_27 = arith.constant 0 : index
    %c1_28 = arith.constant 1 : index
    %c0_29 = arith.constant 0 : index
    %c0_30 = arith.constant 0 : index
    %19 = vector.load %arg4[%c0_27, %c1_28, %c0_29, %c0_30] : memref<1x4x4x128xf32, #tpu.memory_space<vmem>>, vector<1x1x4x128xf32>
    %20 = vector.shape_cast %19 : vector<1x1x4x128xf32> to vector<4x128xf32>
    %21 = vector.broadcast %1 : f32 to vector<4x128xf32>
    %22 = arith.mulf %20, %21 : vector<4x128xf32>
    %23 = arith.addf %18, %22 : vector<4x128xf32>
    %c0_31 = arith.constant 0 : index
    %c2_32 = arith.constant 2 : index
    %c0_33 = arith.constant 0 : index
    %c0_34 = arith.constant 0 : index
    %24 = vector.load %arg4[%c0_31, %c2_32, %c0_33, %c0_34] : memref<1x4x4x128xf32, #tpu.memory_space<vmem>>, vector<1x1x4x128xf32>
    %25 = vector.shape_cast %24 : vector<1x1x4x128xf32> to vector<4x128xf32>
    %26 = vector.broadcast %2 : f32 to vector<4x128xf32>
    %27 = arith.mulf %25, %26 : vector<4x128xf32>
    %28 = arith.addf %23, %27 : vector<4x128xf32>
    %c0_35 = arith.constant 0 : index
    %c3_36 = arith.constant 3 : index
    %c0_37 = arith.constant 0 : index
    %c0_38 = arith.constant 0 : index
    %29 = vector.load %arg4[%c0_35, %c3_36, %c0_37, %c0_38] : memref<1x4x4x128xf32, #tpu.memory_space<vmem>>, vector<1x1x4x128xf32>
    %30 = vector.shape_cast %29 : vector<1x1x4x128xf32> to vector<4x128xf32>
    %31 = vector.broadcast %3 : f32 to vector<4x128xf32>
    %32 = arith.mulf %30, %31 : vector<4x128xf32>
    %33 = arith.addf %28, %32 : vector<4x128xf32>
    %34 = vector.broadcast %12 : f32 to vector<4x128xf32>
    %35 = arith.addf %33, %34 : vector<4x128xf32>
    %c0_39 = arith.constant 0 : index
    %c0_40 = arith.constant 0 : index
    %c0_41 = arith.constant 0 : index
    %c0_42 = arith.constant 0 : index
    %36 = vector.load %arg5[%c0_39, %c0_40, %c0_41, %c0_42] : memref<1x3x4x128xf32, #tpu.memory_space<vmem>>, vector<1x1x4x128xf32>
    %37 = vector.shape_cast %36 : vector<1x1x4x128xf32> to vector<4x128xf32>
    %38 = vector.shape_cast %35 : vector<4x128xf32> to vector<1x1x4x128xf32>
    tpu.vector_store %arg5[%c0_39, %c0_40, %c0_41, %c0_42], %38 {strides = array<i32>} : memref<1x3x4x128xf32, #tpu.memory_space<vmem>>, vector<1x1x4x128xf32>,
    %c0_43 = arith.constant 0 : index
    %c0_44 = arith.constant 0 : index
    %c0_45 = arith.constant 0 : index
    %c0_46 = arith.constant 0 : index
    %39 = vector.load %arg4[%c0_43, %c0_44, %c0_45, %c0_46] : memref<1x4x4x128xf32, #tpu.memory_space<vmem>>, vector<1x1x4x128xf32>
    %40 = vector.shape_cast %39 : vector<1x1x4x128xf32> to vector<4x128xf32>
    %41 = vector.broadcast %4 : f32 to vector<4x128xf32>
    %42 = arith.mulf %40, %41 : vector<4x128xf32>
    %c0_47 = arith.constant 0 : index
    %c1_48 = arith.constant 1 : index
    %c0_49 = arith.constant 0 : index
    %c0_50 = arith.constant 0 : index
    %43 = vector.load %arg4[%c0_47, %c1_48, %c0_49, %c0_50] : memref<1x4x4x128xf32, #tpu.memory_space<vmem>>, vector<1x1x4x128xf32>
    %44 = vector.shape_cast %43 : vector<1x1x4x128xf32> to vector<4x128xf32>
    %45 = vector.broadcast %5 : f32 to vector<4x128xf32>
    %46 = arith.mulf %44, %45 : vector<4x128xf32>
    %47 = arith.addf %42, %46 : vector<4x128xf32>
    %c0_51 = arith.constant 0 : index
    %c2_52 = arith.constant 2 : index
    %c0_53 = arith.constant 0 : index
    %c0_54 = arith.constant 0 : index
    %48 = vector.load %arg4[%c0_51, %c2_52, %c0_53, %c0_54] : memref<1x4x4x128xf32, #tpu.memory_space<vmem>>, vector<1x1x4x128xf32>
    %49 = vector.shape_cast %48 : vector<1x1x4x128xf32> to vector<4x128xf32>
    %50 = vector.broadcast %6 : f32 to vector<4x128xf32>
    %51 = arith.mulf %49, %50 : vector<4x128xf32>
    %52 = arith.addf %47, %51 : vector<4x128xf32>
    %c0_55 = arith.constant 0 : index
    %c3_56 = arith.constant 3 : index
    %c0_57 = arith.constant 0 : index
    %c0_58 = arith.constant 0 : index
    %53 = vector.load %arg4[%c0_55, %c3_56, %c0_57, %c0_58] : memref<1x4x4x128xf32, #tpu.memory_space<vmem>>, vector<1x1x4x128xf32>
    %54 = vector.shape_cast %53 : vector<1x1x4x128xf32> to vector<4x128xf32>
    %55 = vector.broadcast %7 : f32 to vector<4x128xf32>
    %56 = arith.mulf %54, %55 : vector<4x128xf32>
    %57 = arith.addf %52, %56 : vector<4x128xf32>
    %58 = vector.broadcast %13 : f32 to vector<4x128xf32>
    %59 = arith.addf %57, %58 : vector<4x128xf32>
    %c0_59 = arith.constant 0 : index
    %c1_60 = arith.constant 1 : index
    %c0_61 = arith.constant 0 : index
    %c0_62 = arith.constant 0 : index
    %60 = vector.load %arg5[%c0_59, %c1_60, %c0_61, %c0_62] : memref<1x3x4x128xf32, #tpu.memory_space<vmem>>, vector<1x1x4x128xf32>
    %61 = vector.shape_cast %60 : vector<1x1x4x128xf32> to vector<4x128xf32>
    %62 = vector.shape_cast %59 : vector<4x128xf32> to vector<1x1x4x128xf32>
    tpu.vector_store %arg5[%c0_59, %c1_60, %c0_61, %c0_62], %62 {strides = array<i32>} : memref<1x3x4x128xf32, #tpu.memory_space<vmem>>, vector<1x1x4x128xf32>,
    %c0_63 = arith.constant 0 : index
    %c0_64 = arith.constant 0 : index
    %c0_65 = arith.constant 0 : index
    %c0_66 = arith.constant 0 : index
    %63 = vector.load %arg4[%c0_63, %c0_64, %c0_65, %c0_66] : memref<1x4x4x128xf32, #tpu.memory_space<vmem>>, vector<1x1x4x128xf32>
    %64 = vector.shape_cast %63 : vector<1x1x4x128xf32> to vector<4x128xf32>
    %65 = vector.broadcast %8 : f32 to vector<4x128xf32>
    %66 = arith.mulf %64, %65 : vector<4x128xf32>
    %c0_67 = arith.constant 0 : index
    %c1_68 = arith.constant 1 : index
    %c0_69 = arith.constant 0 : index
    %c0_70 = arith.constant 0 : index
    %67 = vector.load %arg4[%c0_67, %c1_68, %c0_69, %c0_70] : memref<1x4x4x128xf32, #tpu.memory_space<vmem>>, vector<1x1x4x128xf32>
    %68 = vector.shape_cast %67 : vector<1x1x4x128xf32> to vector<4x128xf32>
    %69 = vector.broadcast %9 : f32 to vector<4x128xf32>
    %70 = arith.mulf %68, %69 : vector<4x128xf32>
    %71 = arith.addf %66, %70 : vector<4x128xf32>
    %c0_71 = arith.constant 0 : index
    %c2_72 = arith.constant 2 : index
    %c0_73 = arith.constant 0 : index
    %c0_74 = arith.constant 0 : index
    %72 = vector.load %arg4[%c0_71, %c2_72, %c0_73, %c0_74] : memref<1x4x4x128xf32, #tpu.memory_space<vmem>>, vector<1x1x4x128xf32>
    %73 = vector.shape_cast %72 : vector<1x1x4x128xf32> to vector<4x128xf32>
    %74 = vector.broadcast %10 : f32 to vector<4x128xf32>
    %75 = arith.mulf %73, %74 : vector<4x128xf32>
    %76 = arith.addf %71, %75 : vector<4x128xf32>
    %c0_75 = arith.constant 0 : index
    %c3_76 = arith.constant 3 : index
    %c0_77 = arith.constant 0 : index
    %c0_78 = arith.constant 0 : index
    %77 = vector.load %arg4[%c0_75, %c3_76, %c0_77, %c0_78] : memref<1x4x4x128xf32, #tpu.memory_space<vmem>>, vector<1x1x4x128xf32>
    %78 = vector.shape_cast %77 : vector<1x1x4x128xf32> to vector<4x128xf32>
    %79 = vector.broadcast %11 : f32 to vector<4x128xf32>
    %80 = arith.mulf %78, %79 : vector<4x128xf32>
    %81 = arith.addf %76, %80 : vector<4x128xf32>
    %82 = vector.broadcast %14 : f32 to vector<4x128xf32>
    %83 = arith.addf %81, %82 : vector<4x128xf32>
    %c0_79 = arith.constant 0 : index
    %c2_80 = arith.constant 2 : index
    %c0_81 = arith.constant 0 : index
    %c0_82 = arith.constant 0 : index
    %84 = vector.load %arg5[%c0_79, %c2_80, %c0_81, %c0_82] : memref<1x3x4x128xf32, #tpu.memory_space<vmem>>, vector<1x1x4x128xf32>
    %85 = vector.shape_cast %84 : vector<1x1x4x128xf32> to vector<4x128xf32>
    %86 = vector.shape_cast %83 : vector<4x128xf32> to vector<1x1x4x128xf32>
    tpu.vector_store %arg5[%c0_79, %c2_80, %c0_81, %c0_82], %86 {strides = array<i32>} : memref<1x3x4x128xf32, #tpu.memory_space<vmem>>, vector<1x1x4x128xf32>,
    return
  }
  func.func @transform_0(%arg0: i32, %arg1: i32) -> (i32, i32) {
    %c0_i32 = arith.constant 0 : i32
    %c0_i32_0 = arith.constant 0 : i32
    %c0_i32_1 = arith.constant 0 : i32
    return %c0_i32, %c0_i32_0 : i32, i32
  }
  func.func @transform_1(%arg0: i32, %arg1: i32) -> i32 {
    %c0_i32 = arith.constant 0 : i32
    %c0_i32_0 = arith.constant 0 : i32
    return %c0_i32 : i32
  }
  func.func @transform_2(%arg0: i32, %arg1: i32) -> (i32, i32, i32, i32) {
    %c0_i32 = arith.constant 0 : i32
    %c0_i32_0 = arith.constant 0 : i32
    %c0_i32_1 = arith.constant 0 : i32
    return %arg0, %c0_i32, %arg1, %c0_i32_0 : i32, i32, i32, i32
  }
  func.func @transform_3(%arg0: i32, %arg1: i32) -> (i32, i32, i32, i32) {
    %c0_i32 = arith.constant 0 : i32
    %c0_i32_0 = arith.constant 0 : i32
    %c0_i32_1 = arith.constant 0 : i32
    return %arg0, %c0_i32, %arg1, %c0_i32_0 : i32, i32, i32, i32
  }
}

</mosaic_0001>

<bundles_post_ra>
// kernel: tpu_custom_call.1
= control target key start
LH: loop header
LB: loop body
LE: loop exit
PB: predicated region body
PF: predicated region fallthrough
CT: control target
= control target key end

     0   :  { %s920_s0 = inlined_call_operand.hbm [shape: f32[3,4], index: 0, kind: input, shape index: {}]   ;;  %s921_s1 = inlined_call_operand.hbm [shape: f32[3], index: 1, kind: input, shape index: {}]   ;;  %s922_s2 = inlined_call_operand.hbm [shape: f32[2,4,4,128], index: 2, kind: input, shape index: {}]   ;;  %s923_s3 = inlined_call_operand.hbm [shape: f32[2,3,4,128], index: 3, kind: output, shape index: {}]  }
   0x1   :  { %924 = sst [smem:[#allocation14_spill]] %s920_s0 }
   0x2   :  { %8 = vsyncpa [#allocation5], 0 }
   0x3   :  { %9 = vsyncpa [#allocation7], 0 }
   0x4   :  { %10 = vsyncpa [#allocation3], 0 }
   0x5   :  { %12 = vsyncpa [#allocation3 + $0x1], 0 }
   0x6   :  { %13 = vsyncpa [#allocation4], 0 }
   0x7   :  { %15 = vsyncpa [#allocation4 + $0x1], 0  ;;  %s741_s12 = smov 0   ;;  %s743_s13 = smov 0  }
   0x8   :  { %s745_s14 = smov 0   ;;  %s747_s15 = smov 0  }
   0x9   :  { %s749_s16 = smov 0   ;;  %s751_s17 = smov 0  }
   0xa LB: > { %s433_s18 = sadd.s32 4294967295, %s713_s17   ;;  %s434_s19 = sadd.s32 4294967294, %s713_s17   ;;  %s713_s17 = sphi %s751_s17, %s21_s17   ;;  %s709_s16 = sphi %s749_s16, %s937_s16   ;;  %s705_s15 = sphi %s747_s15, %s936_s15   ;;  %s701_s14 = sphi %s745_s14, %s935_s14   ;;  %s697_s13 = sphi %s743_s13, %s934_s13   ;;  %s693_s12 = sphi %s741_s12, %s933_s12  }
   0xb   : > { %s84_s20 = sadd.s32 1, %s701_s14  ;;  %p91_p0 = scmp.ne.s32.totalorder %s701_s14, %s697_s13 }
   0xc   : > { %p92_p1 = scmp.eq.s32.totalorder %s713_s17, 0  ;;  %p97_p2 = scmp.ne.s32.totalorder %s697_s13, %s693_s12 }
   0xd   : > { %p779_p3 = scmp.eq.s32.totalorder %s433_s18, 0  ;;  %p123_p4 = scmp.eq.s32.totalorder %s433_s18, 1 }
   0xe   : > { %p783_p5 = por %p92_p1, %p91_p0  ;;  %p129_p6 = scmp.eq.s32.totalorder %s434_s19, 1 }
   0xf   : > { %p789_p7 = por %p779_p3, %p97_p2  ;;  %p793_p8 = por %p123_p4, %p91_p0 }
  0x10   : > { %p797_p9 = por %p129_p6, %p97_p2  ;;  %p435_p10 = scmp.ge.s32.totalorder %s713_s17, 1 }
  0x11   : > { %p136_p11 = scmp.lt.s32.totalorder %s713_s17, 3  ;;  %s930_s0 = sld [smem:[#allocation14_spill]] }
  0x12   : > { %p438_p13 = scmp.ge.s32.totalorder %s713_s17, 2  ;;  %p505_p0 = scmp.lt.s32.totalorder %s713_s17, 2 }
  0x13   : > { %p806_p12 = pnand %p435_p10, %p136_p11  ;;  %s158_s5 = sshll.u32 %s921_s1, 4  ;;  %s159_s5 = int_to_ptr.hbm [resolvable:$true] %s158_s5 }
  0x14   : > { %p819_p2 = pnand %p505_p0, %p783_p5  ;;  %s715_s7 = smov [#allocation2]  }
  0x15   : > { %p488_p1 = pneg %p806_p12  ;;  %s716_s8 = smov [#allocation6]  }
  0x16   : > { %s33_s9 = sadd.s32 1, %s709_s16  ;;  %s169_s10 = sand.u32 1, %s701_s14  }
  0x17   : > { %s148_s28 = sshll.u32 %s930_s0, 4  ;;  %p489_p4 = pnand %p488_p1, %p779_p3  ;;  %s149_s28 = int_to_ptr.hbm [resolvable:$true] %s148_s28 }
  0x18   : > { %p35_p6 = scmp.ge.s32.totalorder %s33_s9, 2  ;;  %s439_s11 = sshll.u32 %s169_s10, 4 }
  0x19   : > { %491 = dma.hbm_to_smem (!%p489_p4), %s149_s28, 64, %s715_s7, [#allocation5]  }
  0x1a   : > { %494 = dma.hbm_to_smem (!%p489_p4), %s159_s5, 16, %s716_s8, [#allocation7]  }
  0x1b   : > { %s473_s18 = sshll.u32 %s709_s16, 4  ;;  %s939_s9 = smov (%p35_p6, %s33_s9), 0 }
  0x1c   : > { %s179_s26 = scalar_lea.hbm %s922_s2, %s473_s18  ;;  %s79_s27 = ssub.s32 %s709_s16, %s939_s9 }
  0x1d   : > { %s180_s30 = sshll.u32 %s179_s26, 4  ;;  %p82_p5 = scmp.eq.s32.totalorder %s79_s27, 0  ;;  %s181_s30 = int_to_ptr.hbm [resolvable:$true] %s180_s30 }
  0x1e   : > { %s173_s28 = scalar_lea.vmem [#allocation8], %s439_s11  ;;  %s170_s7 = scalar_lea.sflag [#allocation3], %s169_s10 }
  0x1f   : > { %s182_s4 = sshll.u32 %s173_s28, 4  ;;  %s717_s8 = smov 64   ;;  %s183_s4 = int_to_ptr.vmem [resolvable:$true] %s182_s4 }
  0x20   : > { %s838_s5 = scalar_select %p82_p5, %s701_s14, %s84_s20  }
  0x21   : > { %s718_s0 = smov 4   ;;  %194 = sbr.rel (%p806_p12) target bundleno = 79 (0x4f), region = 32 }
  0x22   : > { %498 = dma.hbm_to_vmem [thread:$0]  (!%p819_p2), %s181_s30, 256, %s183_s4, %s170_s7, %s717_s8, %s717_s8, %s718_s0  }
  0x26   : > { %676 = dma.done.wait (%p779_p3), [#allocation5], 64  }
  0x27   : > { %678 = vsyncadd (%p779_p3), [#allocation5], 4294967232 }
  0x28   : > { %680 = dma.done.wait (%p779_p3), [#allocation7], 16  }
  0x29   : > { %682 = vsyncadd (%p779_p3), [#allocation7], 4294967280  ;;  %s853_s20 = sand.u32 1, %s697_s13  }
  0x2a   : > { %s445_s0 = sshll.u32 %s853_s20, 4  ;;  %s207_s29 = scalar_lea.sflag [#allocation3], %s853_s20 }
  0x2b   : > { %s857_s6 = scalar_lea.vmem [#allocation8], %s445_s0 }
  0x2c   : > { %684 = dma.done.wait (%p789_p7), %s207_s29, 256  }
  0x2d   : > { %686 = vsyncadd (%p789_p7), %s207_s29, 4294967040 }
  0x2e   : > { %216 = sfence }
  0x2f   : > { %s235_s10 = sld [smem:[#allocation2]]  ;;  %v250_v0 = vld [vmem:[%s857_s6] sm:$0xf]  ;;  %v459_v1 = vld [vmem:[%s857_s6 + $0x4] sm:$0xf]  ;;  %s474_s4 = smul.u32 12, %s853_s20 }
  0x30   : > { %s446_s21 = sld [smem:[#allocation2 + $0x1]]  ;;  %v460_v3 = vld [vmem:[%s857_s6 + $0x8] sm:$0xf]  ;;  %v461_v6 = vld [vmem:[%s857_s6 + $0xc] sm:$0xf] }
  0x31   : > { %s447_s11 = sld [smem:[#allocation2 + $0x2]]  ;;  %v271_v11 = vld [vmem:[%s857_s6] sm:$0xf]  ;;  %v462_v14 = vld [vmem:[%s857_s6 + $0x4] sm:$0xf] }
  0x32   : > { %s448_s18 = sld [smem:[#allocation2 + $0x3]]  ;;  %v463_v16 = vld [vmem:[%s857_s6 + $0x8] sm:$0xf]  ;;  %v464_v20 = vld [vmem:[%s857_s6 + $0xc] sm:$0xf] }
  0x33   : > { %s863_s19 = sld [smem:[#allocation6]]  ;;  %v290_v27 = vld [vmem:[%s857_s6] sm:$0xf]  ;;  %v466_v30 = vld [vmem:[%s857_s6 + $0x4] sm:$0xf] }
  0x34   : > { %s449_s22 = sld [smem:[#allocation2 + $0x80]]  ;;  %v467_v33 = vld [vmem:[%s857_s6 + $0x8] sm:$0xf]  ;;  %v468_v37 = vld [vmem:[%s857_s6 + $0xc] sm:$0xf] }
  0x35   : > { %v251_v2 = vstv %s235_s10  ;;  %s450_s23 = sld [smem:[#allocation2 + $0x81]]  ;;  %s475_s10 = smul.u32 12, %s705_s15 }
  0x36   : > { %v252_v4 = vmul.f32 %v251_v2, %v250_v0  ;;  %v255_v5 = vstv %s446_s21  ;;  %s451_s26 = sld [smem:[#allocation2 + $0x82]]  ;;  %s234_s21 = scalar_lea.vmem [#allocation9], %s474_s4 }
  0x37   : > { %v256_v7 = vmul.f32 %v459_v1, %v255_v5  ;;  %v260_v8 = vstv %s447_s11  ;;  %s452_s27 = sld [smem:[#allocation2 + $0x83]]  ;;  %s323_s15 = sshll.u32 %s234_s21, 4  ;;  %s324_s15 = int_to_ptr.vmem [resolvable:$true] %s323_s15 }
  0x38   : > { %v261_v9 = vmul.f32 %v460_v3, %v260_v8  ;;  %v265_v10 = vstv %s448_s18  ;;  %s869_s30 = sld [smem:[#allocation6 + $0x1]] }
  0x39   : > { %v257_v12 = vadd.f32 %v256_v7, %v252_v4  ;;  %v266_v13 = vmul.f32 %v461_v6, %v265_v10  ;;  %s453_s28 = sld [smem:[#allocation2 + $0x100]]  ;;  %v268_v21 = vstv %s863_s19  ;;  %s322_s19 = scalar_lea.hbm %s923_s3, %s475_s10 }
  0x3a   : > { %v272_v15 = vstv %s449_s22  ;;  %s454_s7 = sld [smem:[#allocation2 + $0x101]]  ;;  %s325_s6 = sshll.u32 %s322_s19, 4  ;;  %s326_s6 = int_to_ptr.hbm [resolvable:$true] %s325_s6 }
  0x3b   : > { %v262_v17 = vadd.f32 %v261_v9, %v257_v12  ;;  %v273_v18 = vmul.f32 %v272_v15, %v271_v11  ;;  %v275_v19 = vstv %s450_s23  ;;  %s455_s8 = sld [smem:[#allocation2 + $0x102]]  ;;  %s310_s22 = scalar_lea.sflag [#allocation4], %s853_s20 }
  0x3c   : > { %v276_v22 = vmul.f32 %v462_v14, %v275_v19  ;;  %v279_v23 = vstv %s451_s26  ;;  %s456_s0 = sld [smem:[#allocation2 + $0x103]]  ;;  %s637_s23 = sshra.s32 %s326_s6, 4  ;;  %s638_s23 = int_to_ptr.hbm [resolvable:$true] %s637_s23 }
  0x3d   : > { %v267_v24 = vadd.f32 %v266_v13, %v262_v17  ;;  %v280_v25 = vmul.f32 %v463_v16, %v279_v23  ;;  %v283_v26 = vstv %s452_s27  ;;  %s458_s29 = sld [smem:[#allocation6 + $0x2]]  ;;  %s639_s26 = scalar_lea.hbm %s638_s23, 12 }
  0x3e   : > { %v277_v28 = vadd.f32 %v276_v22, %v273_v18  ;;  %v284_v29 = vmul.f32 %v464_v20, %v283_v26  ;;  %v286_v38 = vstv %s869_s30  ;;  %p640_p3 = scmp.ne.s32.totalorder %s638_s23, %s639_s26  ;;  %p644_p11 = scmp.lt.s32.totalorder %s638_s23, %s923_s3 }
  0x3f   : > { %v269_v31 = vadd.f32 %v268_v21, %v267_v24  ;;  %v291_v32 = vstv %s453_s28  ;;  %s643_s28 = scalar_lea.hbm %s923_s3, 24 }
  0x40   : > { %v281_v34 = vadd.f32 %v280_v25, %v277_v28  ;;  %v292_v35 = vmul.f32 %v291_v32, %v290_v27  ;;  %v294_v36 = vstv %s454_s7  ;;  %p641_p7 = pnand %p640_p3, %p793_p8  ;;  %p645_p12 = scmp.lt.s32.totalorder %s643_s28, %s639_s26 }
  0x41   : > { %270 = vst [vmem:[%s234_s21] sm:$0xf] %v269_v31  ;;  %v295_v39 = vmul.f32 %v466_v30, %v294_v36  ;;  %v298_v40 = vstv %s455_s8 }
  0x42   : > { %v285_v41 = vadd.f32 %v284_v29, %v281_v34  ;;  %v299_v42 = vmul.f32 %v467_v33, %v298_v40  ;;  %v302_v43 = vstv %s456_s0  ;;  %p642_p10 = pneg %p641_p7  ;;  %p646_p0 = por %p645_p12, %p644_p11 }
  0x43   : > { %v296_v44 = vadd.f32 %v295_v39, %v292_v35  ;;  %v303_v45 = vmul.f32 %v468_v37, %v302_v43  ;;  %v305_v48 = vstv %s458_s29 }
  0x44   : > { %v287_v46 = vadd.f32 %v286_v38, %v285_v41  ;;  %p647_p1 = pnand %p646_p0, %p642_p10 }
  0x45   : > { %v300_v47 = vadd.f32 %v299_v42, %v296_v44 }
  0x46   : > { %465 = vst [vmem:[%s234_s21 + $0x4] sm:$0xf] %v287_v46 }
  0x47   : > { %v304_v49 = vadd.f32 %v303_v45, %v300_v47 }
  0x49   : > { %v306_v50 = vadd.f32 %v305_v48, %v304_v49 }
  0x4b   : > { %469 = vst [vmem:[%s234_s21 + $0x8] sm:$0xf] %v306_v50 }
  0x4c   : > { %650 = shalt.err (!%p647_p1)
}
  0x4d   : > { %s719_s20 = smov 64   ;;  %s720_s8 = smov 4  }
  0x4e   : > { %486 = dma.vmem_to_hbm [thread:$0]  (%p793_p8), %s324_s15, 192, %s326_s6, %s310_s22, %s719_s20, %s719_s20, %s720_s8  }
  0x4f PF: > { %s340_s0 = sand.u32 1, %s693_s12   ;;  %p500_p2 = pnand %p438_p13, %p797_p9 }
  0x50   : > { %s341_s29 = scalar_lea.sflag [#allocation4], %s340_s0 }
  0x51   : > { %p501_p4 = pneg %p500_p2 }
  0x53   : > { %688 = dma.done.wait (%p501_p4), %s341_s29, 192  }
  0x54   : > { %690 = vsyncadd (%p501_p4), %s341_s29, 4294967104  ;;  %s21_s17 = sadd.s32 1, %s713_s17   ;;  %s933_s12 = smov %s697_s13 }
  0x55   : > { %p18_p6 = scmp.ge.s32.totalorder %s21_s17, 4   ;;  %s934_s13 = smov %s701_s14 }
  0x56   : > { %s935_s14 = smov %s838_s5  ;;  %s936_s15 = smov %s709_s16 }
  0x57   : > { %s937_s16 = smov %s939_s9  ;;  %20 = sbr.rel (!%p18_p6) target bundleno = 10 (0xa), region = 91 }
  0x5c   :  { %347 = vsyncpa [#allocation3], 1 }
  0x5d   :  { %349 = vsyncpa [#allocation3 + $0x1], 1 }
  0x5e   :  { %350 = vsyncpa [#allocation4], 1 }
  0x5f   :  { %352 = vsyncpa [#allocation4 + $0x1], 1 }
  0x60   :  { %353 = vsyncpa [#allocation5], 1 }
  0x61   :  { %355 = vsyncpa [#allocation5 + $0x1], 1 }
  0x62   :  { %356 = vsyncpa [#allocation7], 1 }

</bundles_post_ra>
